<compile_context>
chip_gen: v7x
topology: tpu7x:2x2x1
jax: 0.10.0
libtpu: 0.0.40
codegen_flags: <defaults>
</compile_context>

<pallas_src>
import functools

import jax
import jax.numpy as jnp
from jax.experimental import pallas as pl
from jax.experimental.pallas import tpu as pltpu

# ----- static config (stands in for `args`) -----
USER = 16
ITEM = 16
N = USER + ITEM          # total node count
LATDIM = 32              # args.latdim
GNN_LAYER = 2            # args.gnn_layer
LAYER_MLP = 2            # args.layer_mlp
LN_EPS = 1e-5


def _unlearning_mlp_kernel(a_ref, e0_ref, w_ref, b_ref, gamma_ref, beta_ref,
                           out_ref, *, layer_mlp):
    # a_ref:      (bm, N)    panel of the stacked (B*N, N) A^gnn_layer
    # e0_ref:     (N, D)     shared initial node embeddings
    # w_ref:      (L, D, D)  per-layer Linear weights, stored (in, out) so
    #                        y = x @ W + b
    #                        TODO(synk): torch nn.Linear stores (out, in) --
    #                        transpose when importing real checkpoints.
    # b_ref:      (L, 1, D)  per-layer Linear biases
    # gamma/beta: (1, D)     LayerNorm affine params
    # out_ref:    (bm, D)    LayerNorm'ed embeddings for this row panel

    # UntrainedGCN: all gnn_layer hops were folded into A^gnn_layer outside the
    # hot path (A is constant across forward calls), so a single MXU pass does
    # the full propagation for every batch element's rows at once.
    e = jnp.dot(a_ref[...], e0_ref[...], preferred_element_type=jnp.float32)

    # FeedForwardLayer stack: relu(x @ W + b) + x (residual since act='relu').
    for l in range(layer_mlp):
        h = jnp.dot(e, w_ref[l], preferred_element_type=jnp.float32) + b_ref[l]
        e = jnp.maximum(h, 0.0) + e

    # LayerNorm over the feature dim (biased variance, like torch).
    # sum(x) and sum(x*x) are independent XLU reductions; deriving
    # var = E[x^2] - mean^2 keeps them off each other's critical path.
    # (Fine in f32 at these activation scales; switch to the centered form if
    # the MLP stack deepens.)
    inv_d = 1.0 / e.shape[-1]
    s1 = jnp.sum(e, axis=-1, keepdims=True)
    s2 = jnp.sum(e * e, axis=-1, keepdims=True)
    mean = s1 * inv_d
    var = s2 * inv_d - mean * mean
    gamma = gamma_ref[...]                 # hoisted single reads
    beta = beta_ref[...]
    scale = jax.lax.rsqrt(var + LN_EPS) * gamma     # (bm,1)*(1,D) -> (bm,D)
    shift = beta - mean * scale                     # fold mean & beta: 2 ops/elem
    out_ref[...] = e * scale + shift


def propagate_adjacency(adj):
    """Folds the gnn_layer GCN hops into A^gnn_layer.

    `adj` is (N, N) or (B, N, N) dense symmetric-normalized adjacency. In the
    module the adjacency is fixed across forward calls, so this runs once,
    outside the per-step hot path.
    """
    a_prop = adj
    for _ in range(GNN_LAYER - 1):
        a_prop = a_prop @ adj       # batched matmul over the last two dims
    return a_prop


def unlearning_mlp_forward(a_prop, ini_embeds, weights, biases, gamma, beta):
    """Batched UnlearningMLP forward in one Pallas kernel.

    a_prop: (B, N, N) precomputed A^gnn_layer, one per independent forward
            pass (e.g. original graph + unlearned graphs). (N, N) also accepted.
    Returns (usr_embeds, itm_embeds) with shapes (B, USER, D), (B, ITEM, D).
    """
    if a_prop.ndim == 2:
        a_prop = a_prop[None]
    b, n, _ = a_prop.shape
    _, d = ini_embeds.shape
    l = weights.shape[0]

    # Fold the batch into the matmul M dimension: one (B*N, N) @ (N, D) GCN
    # matmul and one (B*N, D) @ (D, D) per MLP layer (E0, W, b, gamma, beta are
    # shared and row-wise, so stacking is exact).
    m = b * n
    a_stacked = a_prop.reshape(m, n)

    # Single grid step while everything fits one MXU-sized panel; tile M into
    # 256-row panels (independent -> "parallel", v7x-core shardable) once B*N
    # grows past that.
    if m <= 256 or m % 256 != 0:
        bm = m
    else:
        bm = 256
    grid = (m // bm,)

    # TODO(synk): for realistic node counts the dense (N, N) adjacency must be
    # replaced by a tiled CSR SpMM (PrefetchScalarGridSpec with row offsets,
    # reduction axis last, pl.when-init accumulator), with tiles sized against
    # v7x's 64 MiB VMEM (and A^gnn_layer folding reconsidered: A^2 densifies).
    kernel = functools.partial(_unlearning_mlp_kernel, layer_mlp=LAYER_MLP)

    out = pl.pallas_call(
        kernel,
        out_shape=jax.ShapeDtypeStruct((m, d), jnp.float32),
        grid_spec=pltpu.PrefetchScalarGridSpec(
            num_scalar_prefetch=0,
            grid=grid,
            in_specs=[
                pl.BlockSpec((bm, n), lambda i: (i, 0)),        # stacked A^g
                pl.BlockSpec((n, d), lambda i: (0, 0)),         # shared E0
                pl.BlockSpec((l, d, d), lambda i: (0, 0, 0)),   # shared weights
                pl.BlockSpec((l, 1, d), lambda i: (0, 0, 0)),   # shared biases
                pl.BlockSpec((1, d), lambda i: (0, 0)),         # gamma
                pl.BlockSpec((1, d), lambda i: (0, 0)),         # beta
            ],
            out_specs=pl.BlockSpec((bm, d), lambda i: (i, 0)),  # one slab
        ),
        # Row panels are independent -> shardable across both TCs on v7x.
        compiler_params=pltpu.CompilerParams(
            dimension_semantics=("parallel",)),
    )(a_stacked, ini_embeds, weights, biases, gamma, beta)

    # User/item split is a plain (free) XLA slice on the tiny output slab.
    out = out.reshape(b, n, d)
    return out[:, :USER, :], out[:, USER:, :]


def _reference_forward(adj, ini_embeds, weights, biases, gamma, beta):
    """Pure-JAX reference with the original op ordering (per batch element)."""
    e = ini_embeds
    for _ in range(GNN_LAYER):
        e = adj @ e
    for li in range(LAYER_MLP):
        e = jnp.maximum(e @ weights[li] + biases[li][0], 0.0) + e
    mean = jnp.mean(e, axis=-1, keepdims=True)
    var = jnp.mean((e - mean) ** 2, axis=-1, keepdims=True)
    e = (e - mean) / jnp.sqrt(var + LN_EPS) * gamma[0] + beta[0]
    return e[:USER], e[USER:]


def _make_adj(key):
    """Dense symmetric-normalized bipartite adjacency A = D^-1/2 [[0,R],[R^T,0]] D^-1/2."""
    r = (jax.random.uniform(key, (USER, ITEM)) > 0.5).astype(jnp.float32)
    top = jnp.concatenate([jnp.zeros((USER, USER)), r], axis=1)
    bot = jnp.concatenate([r.T, jnp.zeros((ITEM, ITEM))], axis=1)
    a = jnp.concatenate([top, bot], axis=0)
    deg = jnp.maximum(a.sum(axis=1), 1.0)
    d_inv_sqrt = 1.0 / jnp.sqrt(deg)
    return a * d_inv_sqrt[:, None] * d_inv_sqrt[None, :]


if __name__ == "__main__":
    key = jax.random.PRNGKey(0)
    k_a0, k_a1, k_emb, k_w, k_b = jax.random.split(key, 5)

    # Two independent graphs (e.g. original graph + unlearned variant) folded
    # into a single Pallas grid step via the stacked M dimension.
    adjs = jnp.stack([_make_adj(k_a0), _make_adj(k_a1)], axis=0)   # (B, N, N)

    # ini_embeds: xavier_uniform over (N, LATDIM) (shared across the batch)
    bound = jnp.sqrt(6.0 / (N + LATDIM))
    ini_embeds = jax.random.uniform(
        k_emb, (N, LATDIM), minval=-bound, maxval=bound, dtype=jnp.float32)

    # Linear layers: stored as (in, out) so kernel does x @ W + b
    wb = 1.0 / jnp.sqrt(LATDIM)
    weights = jax.random.uniform(
        k_w, (LAYER_MLP, LATDIM, LATDIM), minval=-wb, maxval=wb,
        dtype=jnp.float32)
    biases = jax.random.uniform(
        k_b, (LAYER_MLP, 1, LATDIM), minval=-wb, maxval=wb, dtype=jnp.float32)

    # LayerNorm affine params (torch defaults: gamma=1, beta=0)
    gamma = jnp.ones((1, LATDIM), jnp.float32)
    beta = jnp.zeros((1, LATDIM), jnp.float32)

    # One-time precompute: fold the gnn_layer hops into A^gnn_layer.
    a_prop = propagate_adjacency(adjs)

    usr_embeds, itm_embeds = unlearning_mlp_forward(
        a_prop, ini_embeds, weights, biases, gamma, beta)
    jax.block_until_ready((usr_embeds, itm_embeds))

    assert usr_embeds.shape == (adjs.shape[0], USER, LATDIM)
    assert itm_embeds.shape == (adjs.shape[0], ITEM, LATDIM)
    for bi in range(adjs.shape[0]):
        ref_usr, ref_itm = _reference_forward(
            adjs[bi], ini_embeds, weights, biases, gamma, beta)
        assert jnp.allclose(usr_embeds[bi], ref_usr, atol=1e-4, rtol=1e-4)
        assert jnp.allclose(itm_embeds[bi], ref_itm, atol=1e-4, rtol=1e-4)

    print("KERNEL_OK")
</pallas_src>

<mosaic_0001>
module attributes {stable_mosaic.version = 11 : i64} {
  func.func @_unlearning_mlp_kernel(%arg0: i32, %arg1: memref<64x32xf32, #tpu.memory_space<vmem>>, %arg2: memref<32x32xf32, #tpu.memory_space<vmem>>, %arg3: memref<2x32x32xf32, #tpu.memory_space<vmem>>, %arg4: memref<2x1x32xf32, #tpu.memory_space<vmem>>, %arg5: memref<1x32xf32, #tpu.memory_space<vmem>>, %arg6: memref<1x32xf32, #tpu.memory_space<vmem>>, %arg7: memref<64x32xf32, #tpu.memory_space<vmem>>) attributes {dimension_semantics = [#tpu.dimension_semantics<parallel>], iteration_bounds = array<i64: 1>, scalar_prefetch = 0 : i64, scratch_operands = 0 : i64, tpu.core_type = #tpu.core_type<tc>, window_params = [{transform_indices = @transform_0, window_bounds = array<i64: 64, 32>}, {pipeline_mode = #tpu.pipeline_mode<synchronous>, transform_indices = @transform_1, window_bounds = array<i64: 32, 32>}, {pipeline_mode = #tpu.pipeline_mode<synchronous>, transform_indices = @transform_2, window_bounds = array<i64: 2, 32, 32>}, {pipeline_mode = #tpu.pipeline_mode<synchronous>, transform_indices = @transform_3, window_bounds = array<i64: 2, 1, 32>}, {pipeline_mode = #tpu.pipeline_mode<synchronous>, transform_indices = @transform_4, window_bounds = array<i64: 1, 32>}, {pipeline_mode = #tpu.pipeline_mode<synchronous>, transform_indices = @transform_5, window_bounds = array<i64: 1, 32>}, {transform_indices = @transform_6, window_bounds = array<i64: 64, 32>}]} {
    %c0 = arith.constant 0 : index
    %c0_0 = arith.constant 0 : index
    %0 = vector.load %arg1[%c0, %c0_0] : memref<64x32xf32, #tpu.memory_space<vmem>>, vector<64x32xf32>
    %c0_1 = arith.constant 0 : index
    %c0_2 = arith.constant 0 : index
    %1 = vector.load %arg2[%c0_1, %c0_2] : memref<32x32xf32, #tpu.memory_space<vmem>>, vector<32x32xf32>
    %cst = arith.constant dense<0.000000e+00> : vector<64x32xf32>
    %2 = tpu.matmul %0, %1, %cst {dimension_numbers = #tpu.dot_dimension_numbers<[1], [0], [0], [1], [0, 0, 1, 1], [], []>} : vector<64x32xf32>, vector<32x32xf32>, vector<64x32xf32> -> vector<64x32xf32>
    %c0_3 = arith.constant 0 : index
    %c0_4 = arith.constant 0 : index
    %c0_5 = arith.constant 0 : index
    %3 = vector.load %arg3[%c0_3, %c0_4, %c0_5] : memref<2x32x32xf32, #tpu.memory_space<vmem>>, vector<1x32x32xf32>
    %4 = vector.shape_cast %3 : vector<1x32x32xf32> to vector<32x32xf32>
    %cst_6 = arith.constant dense<0.000000e+00> : vector<64x32xf32>
    %5 = tpu.matmul %2, %4, %cst_6 {dimension_numbers = #tpu.dot_dimension_numbers<[1], [0], [0], [1], [0, 0, 1, 1], [], []>} : vector<64x32xf32>, vector<32x32xf32>, vector<64x32xf32> -> vector<64x32xf32>
    %c0_7 = arith.constant 0 : index
    %c0_8 = arith.constant 0 : index
    %c0_9 = arith.constant 0 : index
    %6 = vector.load %arg4[%c0_7, %c0_8, %c0_9] : memref<2x1x32xf32, #tpu.memory_space<vmem>>, vector<1x1x32xf32>
    %7 = vector.shape_cast %6 : vector<1x1x32xf32> to vector<1x32xf32>
    %8 = vector.broadcast %7 : vector<1x32xf32> to vector<64x32xf32>
    %9 = arith.addf %5, %8 : vector<64x32xf32>
    %cst_10 = arith.constant 0.000000e+00 : f32
    %10 = vector.broadcast %cst_10 : f32 to vector<64x32xf32>
    %11 = arith.maximumf %9, %10 : vector<64x32xf32>
    %12 = arith.addf %11, %2 : vector<64x32xf32>
    %c1 = arith.constant 1 : index
    %c0_11 = arith.constant 0 : index
    %c0_12 = arith.constant 0 : index
    %13 = vector.load %arg3[%c1, %c0_11, %c0_12] : memref<2x32x32xf32, #tpu.memory_space<vmem>>, vector<1x32x32xf32>
    %14 = vector.shape_cast %13 : vector<1x32x32xf32> to vector<32x32xf32>
    %cst_13 = arith.constant dense<0.000000e+00> : vector<64x32xf32>
    %15 = tpu.matmul %12, %14, %cst_13 {dimension_numbers = #tpu.dot_dimension_numbers<[1], [0], [0], [1], [0, 0, 1, 1], [], []>} : vector<64x32xf32>, vector<32x32xf32>, vector<64x32xf32> -> vector<64x32xf32>
    %c1_14 = arith.constant 1 : index
    %c0_15 = arith.constant 0 : index
    %c0_16 = arith.constant 0 : index
    %16 = vector.load %arg4[%c1_14, %c0_15, %c0_16] : memref<2x1x32xf32, #tpu.memory_space<vmem>>, vector<1x1x32xf32>
    %17 = vector.shape_cast %16 : vector<1x1x32xf32> to vector<1x32xf32>
    %18 = vector.broadcast %17 : vector<1x32xf32> to vector<64x32xf32>
    %19 = arith.addf %15, %18 : vector<64x32xf32>
    %cst_17 = arith.constant 0.000000e+00 : f32
    %20 = vector.broadcast %cst_17 : f32 to vector<64x32xf32>
    %21 = arith.maximumf %19, %20 : vector<64x32xf32>
    %22 = arith.addf %21, %12 : vector<64x32xf32>
    %cst_18 = arith.constant dense<0.000000e+00> : vector<64xf32>
    %23 = vector.multi_reduction <add>, %22, %cst_18 [1] : vector<64x32xf32> to vector<64xf32>
    %24 = vector.shape_cast %23 : vector<64xf32> to vector<64x1xf32>
    %25 = arith.mulf %22, %22 : vector<64x32xf32>
    %cst_19 = arith.constant dense<0.000000e+00> : vector<64xf32>
    %26 = vector.multi_reduction <add>, %25, %cst_19 [1] : vector<64x32xf32> to vector<64xf32>
    %27 = vector.shape_cast %26 : vector<64xf32> to vector<64x1xf32>
    %cst_20 = arith.constant 3.125000e-02 : f32
    %28 = vector.broadcast %cst_20 : f32 to vector<64x1xf32>
    %29 = arith.mulf %24, %28 : vector<64x1xf32>
    %cst_21 = arith.constant 3.125000e-02 : f32
    %30 = vector.broadcast %cst_21 : f32 to vector<64x1xf32>
    %31 = arith.mulf %27, %30 : vector<64x1xf32>
    %32 = arith.mulf %29, %29 : vector<64x1xf32>
    %33 = arith.subf %31, %32 : vector<64x1xf32>
    %c0_22 = arith.constant 0 : index
    %c0_23 = arith.constant 0 : index
    %34 = vector.load %arg5[%c0_22, %c0_23] : memref<1x32xf32, #tpu.memory_space<vmem>>, vector<1x32xf32>
    %c0_24 = arith.constant 0 : index
    %c0_25 = arith.constant 0 : index
    %35 = vector.load %arg6[%c0_24, %c0_25] : memref<1x32xf32, #tpu.memory_space<vmem>>, vector<1x32xf32>
    %cst_26 = arith.constant 9.99999974E-6 : f32
    %36 = vector.broadcast %cst_26 : f32 to vector<64x1xf32>
    %37 = arith.addf %33, %36 : vector<64x1xf32>
    %38 = math.rsqrt %37 : vector<64x1xf32>
    %39 = vector.broadcast %38 : vector<64x1xf32> to vector<64x32xf32>
    %40 = vector.broadcast %34 : vector<1x32xf32> to vector<64x32xf32>
    %41 = arith.mulf %39, %40 : vector<64x32xf32>
    %42 = vector.broadcast %29 : vector<64x1xf32> to vector<64x32xf32>
    %43 = arith.mulf %42, %41 : vector<64x32xf32>
    %44 = vector.broadcast %35 : vector<1x32xf32> to vector<64x32xf32>
    %45 = arith.subf %44, %43 : vector<64x32xf32>
    %46 = arith.mulf %22, %41 : vector<64x32xf32>
    %47 = arith.addf %46, %45 : vector<64x32xf32>
    %c0_27 = arith.constant 0 : index
    %c0_28 = arith.constant 0 : index
    %48 = vector.load %arg7[%c0_27, %c0_28] : memref<64x32xf32, #tpu.memory_space<vmem>>, vector<64x32xf32>
    tpu.vector_store %arg7[%c0_27, %c0_28], %47 {strides = array<i32>} : memref<64x32xf32, #tpu.memory_space<vmem>>, vector<64x32xf32>,
    return
  }
  func.func @transform_0(%arg0: i32) -> (i32, i32) {
    %c0_i32 = arith.constant 0 : i32
    %c0_i32_0 = arith.constant 0 : i32
    return %arg0, %c0_i32 : i32, i32
  }
  func.func @transform_1(%arg0: i32) -> (i32, i32) {
    %c0_i32 = arith.constant 0 : i32
    %c0_i32_0 = arith.constant 0 : i32
    %c0_i32_1 = arith.constant 0 : i32
    return %c0_i32, %c0_i32_0 : i32, i32
  }
  func.func @transform_2(%arg0: i32) -> (i32, i32, i32) {
    %c0_i32 = arith.constant 0 : i32
    %c0_i32_0 = arith.constant 0 : i32
    %c0_i32_1 = arith.constant 0 : i32
    %c0_i32_2 = arith.constant 0 : i32
    return %c0_i32, %c0_i32_0, %c0_i32_1 : i32, i32, i32
  }
  func.func @transform_3(%arg0: i32) -> (i32, i32, i32) {
    %c0_i32 = arith.constant 0 : i32
    %c0_i32_0 = arith.constant 0 : i32
    %c0_i32_1 = arith.constant 0 : i32
    %c0_i32_2 = arith.constant 0 : i32
    return %c0_i32, %c0_i32_0, %c0_i32_1 : i32, i32, i32
  }
  func.func @transform_4(%arg0: i32) -> (i32, i32) {
    %c0_i32 = arith.constant 0 : i32
    %c0_i32_0 = arith.constant 0 : i32
    %c0_i32_1 = arith.constant 0 : i32
    return %c0_i32, %c0_i32_0 : i32, i32
  }
  func.func @transform_5(%arg0: i32) -> (i32, i32) {
    %c0_i32 = arith.constant 0 : i32
    %c0_i32_0 = arith.constant 0 : i32
    %c0_i32_1 = arith.constant 0 : i32
    return %c0_i32, %c0_i32_0 : i32, i32
  }
  func.func @transform_6(%arg0: i32) -> (i32, i32) {
    %c0_i32 = arith.constant 0 : i32
    %c0_i32_0 = arith.constant 0 : i32
    return %arg0, %c0_i32 : i32, i32
  }
}

</mosaic_0001>

<bundles_post_ra>
// kernel: tpu_custom_call.1
= control target key start
LH: loop header
LB: loop body
LE: loop exit
PB: predicated region body
PF: predicated region fallthrough
CT: control target
= control target key end

     0   :  { %vm35_vm0 = vcmask 261120   ;;  %s1093_s1 = inlined_call_operand.vmem [shape: f32[32,32], index: 1, kind: input, shape index: {}]   ;;  %s1094_s0 = inlined_call_operand.vmem [shape: f32[64,32], index: 0, kind: input, shape index: {}]   ;;  %s1095_s2 = inlined_call_operand.vmem [shape: f32[2,32,32], index: 2, kind: input, shape index: {}]   ;;  %s1096_s3 = inlined_call_operand.vmem [shape: f32[2,1,32], index: 3, kind: input, shape index: {}]   ;;  %s1097_s4 = inlined_call_operand.vmem [shape: f32[1,32], index: 4, kind: input, shape index: {}]   ;;  %s1098_s5 = inlined_call_operand.vmem [shape: f32[1,32], index: 5, kind: input, shape index: {}]   ;;  %s1099_s6 = inlined_call_operand.vmem [shape: f32[64,32], index: 6, kind: output, shape index: {}]  }
   0x1   :  { %v31_v0 = vld [vmem:[%s1093_s1] sm:$0xff]  ;;  %v32_v1 = vld [vmem:[%s1093_s1 + $0x8] sm:$0xff]  ;;  %v33_v2 = vld [vmem:[%s1093_s1 + $0x10] sm:$0xff] }
   0x2   :  { %v778_v3 = vpack.c.bf16 %v32_v1, %v31_v0  ;;  %v34_v4 = vld [vmem:[%s1093_s1 + $0x18] sm:$0xff]  ;;  %v23_v5 = vld [vmem:[%s1094_s0] sm:$0xff]  ;;  %v166_v9 = vld [vmem:[%s1095_s2 + $0x8] sm:$0xff] }
   0x3   :  { %v782_v6 = vpack.c.bf16 %v34_v4, %v33_v2  ;;  %726 = vmatprep.mubr.msk.f32.mxu0 %vm35_vm0, %v23_v5  ;;  %v27_v7 = vld [vmem:[%s1094_s0 + $0x20] sm:$0xff]  ;;  %v167_v11 = vld [vmem:[%s1095_s2 + $0x10] sm:$0xff]  ;;  %v168_v12 = vld [vmem:[%s1095_s2 + $0x18] sm:$0xff] }
   0x4   :  { %779 = vmatprep.subr.bf16.mxu0 %v778_v3  ;;  %802 = vmatprep.subr.bf16.mxu1 %v778_v3  ;;  %v165_v8 = vld [vmem:[%s1095_s2] sm:$0xff]  ;;  %v24_v13 = vld [vmem:[%s1094_s0 + $0x8] sm:$0xff]  ;;  %v25_v15 = vld [vmem:[%s1094_s0 + $0x10] sm:$0xff]  ;;  %v790_v17 = vpack.c.bf16 %v168_v12, %v167_v11 }
   0x5   :  { %781 = vmatpush3.bf16.msra.mxu0 %v778_v3  ;;  %804 = vmatpush3.bf16.msra.mxu1 %v778_v3  ;;  %v786_v10 = vpack.c.bf16 %v166_v9, %v165_v8  ;;  %v28_v14 = vld [vmem:[%s1094_s0 + $0x28] sm:$0xff]  ;;  %v29_v16 = vld [vmem:[%s1094_s0 + $0x30] sm:$0xff]  ;;  %v26_v18 = vld [vmem:[%s1094_s0 + $0x18] sm:$0xff] }
   0x6   :  { %783 = vmatprep.subr.bf16.mxu0 %v782_v6  ;;  %803 = vmatprep.subr.bf16.mxu1 %v782_v6  ;;  %v30_v19 = vld [vmem:[%s1094_s0 + $0x38] sm:$0xff]  ;;  %v666_v28 = vld [vmem:[%s1095_s2 + $0x20] sm:$0xff]  ;;  %v667_v29 = vld [vmem:[%s1095_s2 + $0x28] sm:$0xff] }
   0x7   :  { %732 = vmatprep.mubr.msk.f32.mxu1 %vm35_vm0, %v27_v7  ;;  %v794_v30 = vpack.c.bf16 %v667_v29, %v666_v28  ;;  %v668_v31 = vld [vmem:[%s1095_s2 + $0x30] sm:$0xff]  ;;  %v669_v32 = vld [vmem:[%s1095_s2 + $0x38] sm:$0xff]  ;;  %v657_v34 = vld [vmem:[%s1096_s3] ss:$0 sm:$0xff] }
   0x8   :  { %v798_v33 = vpack.c.bf16 %v669_v32, %v668_v31  ;;  %v671_v3 = vld [vmem:[%s1096_s3 + $0x1] ss:$0 sm:$0xff] }
   0x9   :  { %785 = vmatpush3.bf16.msra.mxu0 %v782_v6  ;;  %805 = vmatpush3.bf16.msra.mxu1 %v782_v6 }
   0xa   :  { %787 = vmatprep.subr.bf16.mxu1 %v786_v10  ;;  %795 = vmatprep.subr.bf16.mxu0 %v794_v30 }
   0xc   :  { %727 = vmatmul.mubr.msk.f32.vlgmr.msra.gmra.mrb[0].mxu0 %vm35_vm0, %v24_v13  ;;  %733 = vmatmul.mubr.msk.f32.vlgmr.msra.gmra.mrb[0].mxu1 %vm35_vm0, %v28_v14 }
   0xd   :  { %729 = vmatprep.mubr.msk.f32.mxu0 %vm35_vm0, %v25_v15  ;;  %735 = vmatprep.mubr.msk.f32.mxu1 %vm35_vm0, %v29_v16 }
   0xe   :  { %789 = vmatpush3.bf16.msra.mxu1 %v786_v10  ;;  %797 = vmatpush3.bf16.msra.mxu0 %v794_v30 }
   0xf   :  { %791 = vmatprep.subr.bf16.mxu1 %v790_v17  ;;  %799 = vmatprep.subr.bf16.mxu0 %v798_v33 }
  0x10   :  { %730 = vmatmul.mubr.msk.f32.gmra.mrb[2].mxu0 %vm35_vm0, %v26_v18  ;;  %736 = vmatmul.mubr.msk.f32.gmra.mrb[2].mxu1 %vm35_vm0, %v30_v19 }
  0x12   :  { %793 = vmatpush3.bf16.msra.mxu1 %v790_v17  ;;  %801 = vmatpush3.bf16.msra.mxu0 %v798_v33 }
  0xdf   :  { %v728_v20 = vpop.f32.mrb[0].mxu0  ;;  %v734_v21 = vpop.f32.mrb[0].mxu1 }
  0xe0   :  { %v126_v22 = vpop.f32.mrb[1].mxu0  ;;  %v146_v23 = vpop.f32.mrb[1].mxu1 }
  0xe1   :  { %746 = vmatprep.mubr.msk.f32.mxu1 %vm35_vm0, %v126_v22 }
  0xe2   :  { %747 = vmatmul.mubr.msk.f32.vlgmr.msra.gmra.mrb[4].mxu1 %vm35_vm0, %v728_v20 }
  0xe3   :  { %v731_v24 = vpop.f32.mrb[2].mxu0  ;;  %v737_v25 = vpop.f32.mrb[2].mxu1 }
  0xe4   :  { %v136_v26 = vpop.f32.mrb[3].mxu0  ;;  %v156_v27 = vpop.f32.mrb[3].mxu1 }
  0xe5   :  { %749 = vmatprep.mubr.msk.f32.mxu1 %vm35_vm0, %v136_v26 }
  0xe6   :  { %750 = vmatmul.mubr.msk.f32.gmra.mrb[6].mxu1 %vm35_vm0, %v731_v24 }
  0xe7   :  { %752 = vmatprep.mubr.msk.f32.mxu1 %vm35_vm0, %v146_v23 }
  0xea   :  { %753 = vmatmul.mubr.msk.f32.gmra.mrb[8].mxu1 %vm35_vm0, %v734_v21 }
  0xeb   :  { %755 = vmatprep.mubr.msk.f32.mxu1 %vm35_vm0, %v156_v27 }
  0xee   :  { %756 = vmatmul.mubr.msk.f32.gmra.mrb[10].mxu1 %vm35_vm0, %v737_v25 }
 0x1b5   :  { %v748_v35 = vpop.f32.mrb[4].mxu1 }
 0x1b6   :  { %v272_v36 = vadd.f32 %v748_v35, %v657_v34  ;;  %v266_v37 = vpop.f32.mrb[5].mxu1 }
 0x1b7   :  { %v267_v38 = vadd.f32 %v657_v34, %v266_v37 }
 0x1b8   :  { %v306_v39 = vmax.f32 %v272_v36, 0.0 }
 0x1b9   :  { %v305_v40 = vmax.f32 %v267_v38, 0.0  ;;  %v751_v41 = vpop.f32.mrb[6].mxu1 }
 0x1ba   :  { %v314_v42 = vadd.f32 %v728_v20, %v306_v39  ;;  %v282_v43 = vadd.f32 %v751_v41, %v657_v34  ;;  %v276_v44 = vpop.f32.mrb[7].mxu1 }
 0x1bb   :  { %v313_v45 = vadd.f32 %v305_v40, %v126_v22  ;;  %v277_v46 = vadd.f32 %v657_v34, %v276_v44 }
 0x1bc   :  { %v308_v47 = vmax.f32 %v282_v43, 0.0 }
 0x1bd   :  { %v307_v48 = vmax.f32 %v277_v46, 0.0  ;;  %v754_v49 = vpop.f32.mrb[8].mxu1  ;;  %766 = vmatprep.mubr.msk.f32.mxu0 %vm35_vm0, %v313_v45 }
 0x1be   :  { %v316_v50 = vadd.f32 %v731_v24, %v308_v47  ;;  %v292_v51 = vadd.f32 %v754_v49, %v657_v34  ;;  %v286_v52 = vpop.f32.mrb[9].mxu1  ;;  %767 = vmatmul.mubr.msk.f32.vlgmr.msra.gmra.mrb[4].mxu0 %vm35_vm0, %v314_v42 }
 0x1bf   :  { %v315_v53 = vadd.f32 %v307_v48, %v136_v26  ;;  %v287_v54 = vadd.f32 %v657_v34, %v286_v52 }
 0x1c0   :  { %v310_v55 = vmax.f32 %v292_v51, 0.0 }
 0x1c1   :  { %v309_v56 = vmax.f32 %v287_v54, 0.0  ;;  %v757_v57 = vpop.f32.mrb[10].mxu1  ;;  %769 = vmatprep.mubr.msk.f32.mxu0 %vm35_vm0, %v315_v53 }
 0x1c2   :  { %v318_v58 = vadd.f32 %v734_v21, %v310_v55  ;;  %v302_v59 = vadd.f32 %v757_v57, %v657_v34  ;;  %v296_v60 = vpop.f32.mrb[11].mxu1  ;;  %770 = vmatmul.mubr.msk.f32.gmra.mrb[6].mxu0 %vm35_vm0, %v316_v50 }
 0x1c3   :  { %v317_v61 = vadd.f32 %v309_v56, %v146_v23  ;;  %v297_v62 = vadd.f32 %v657_v34, %v296_v60 }
 0x1c4   :  { %v312_v63 = vmax.f32 %v302_v59, 0.0 }
 0x1c5   :  { %v311_v0 = vmax.f32 %v297_v62, 0.0  ;;  %772 = vmatprep.mubr.msk.f32.mxu0 %vm35_vm0, %v317_v61 }
 0x1c6   :  { %v941_v1 = vadd.f32 %v737_v25, %v312_v63  ;;  %773 = vmatmul.mubr.msk.f32.gmra.mrb[8].mxu0 %vm35_vm0, %v318_v58 }
 0x1c7   :  { %v319_v2 = vadd.f32 %v311_v0, %v156_v27 }
 0x1c9   :  { %775 = vmatprep.mubr.msk.f32.mxu0 %vm35_vm0, %v319_v2 }
 0x1ca   :  { %776 = vmatmul.mubr.msk.f32.gmra.mrb[10].mxu0 %vm35_vm0, %v941_v1 }
 0x291   :  { %v768_v4 = vpop.f32.mrb[4].mxu0 }
 0x292   :  { %v430_v5 = vadd.f32 %v768_v4, %v671_v3  ;;  %v424_v6 = vpop.f32.mrb[5].mxu0 }
 0x293   :  { %v425_v7 = vadd.f32 %v671_v3, %v424_v6 }
 0x294   :  { %v464_v8 = vmax.f32 %v430_v5, 0.0 }
 0x295   :  { %v463_v9 = vmax.f32 %v425_v7, 0.0  ;;  %v771_v10 = vpop.f32.mrb[6].mxu0 }
 0x296   :  { %v950_v11 = vadd.f32 %v464_v8, %v314_v42  ;;  %v440_v12 = vadd.f32 %v771_v10, %v671_v3  ;;  %v434_v13 = vpop.f32.mrb[7].mxu0 }
 0x297   :  { %v435_v14 = vadd.f32 %v671_v3, %v434_v13  ;;  %v952_v15 = vadd.f32 %v463_v9, %v313_v45 }
 0x298   :  { %v466_v16 = vmax.f32 %v440_v12, 0.0  ;;  %v482_v17 = vsel %vm35_vm0, %v950_v11, 0.0  ;;  %v504_v18 = vmul.f32 %v950_v11, %v950_v11 }
 0x299   :  { %v465_v19 = vmax.f32 %v435_v14, 0.0  ;;  %483 = vadd.xlane.f32.xlu0 %v482_v17  ;;  %v774_v20 = vpop.f32.mrb[8].mxu0  ;;  %v479_v26 = vsel %vm35_vm0, %v952_v15, 0.0  ;;  %v503_v27 = vmul.f32 %v952_v15, %v952_v15 }
 0x29a   :  { %v958_v21 = vadd.f32 %v466_v16, %v316_v50  ;;  %v444_v22 = vpop.f32.mrb[9].mxu0  ;;  %v514_v23 = vsel %vm35_vm0, %v504_v18, 0.0  ;;  %v450_v29 = vadd.f32 %v774_v20, %v671_v3 }
 0x29b   :  { %515 = vadd.xlane.f32.xlu1 %v514_v23  ;;  %v961_v24 = vadd.f32 %v465_v19, %v315_v53  ;;  %v445_v25 = vadd.f32 %v671_v3, %v444_v22  ;;  %v511_v33 = vsel %vm35_vm0, %v503_v27, 0.0 }
 0x29c   :  { %v488_v31 = vsel %vm35_vm0, %v958_v21, 0.0  ;;  %v468_v35 = vmax.f32 %v450_v29, 0.0  ;;  %v506_v37 = vmul.f32 %v958_v21, %v958_v21 }
 0x29d   :  { %480 = vadd.xlane.f32.xlu0 %v479_v26  ;;  %v777_v28 = vpop.f32.mrb[10].mxu0  ;;  %v467_v32 = vmax.f32 %v445_v25, 0.0  ;;  %v505_v34 = vmul.f32 %v961_v24, %v961_v24  ;;  %v485_v36 = vsel %vm35_vm0, %v961_v24, 0.0  ;;  %v1018_v26 = vld [vmem:[%s1097_s4] ss:$0 sm:$0xff] }
 0x29e   :  { %v454_v30 = vpop.f32.mrb[11].mxu0  ;;  %v979_v41 = vadd.f32 %v468_v35, %v318_v58  ;;  %v460_v42 = vadd.f32 %v777_v28, %v671_v3  ;;  %v520_v43 = vsel %vm35_vm0, %v506_v37, 0.0 }
 0x29f   :  { %489 = vadd.xlane.f32.xlu1 %v488_v31  ;;  %v976_v38 = vadd.f32 %v467_v32, %v317_v61  ;;  %v455_v39 = vadd.f32 %v671_v3, %v454_v30  ;;  %v517_v40 = vsel %vm35_vm0, %v505_v34, 0.0 }
 0x2a0   :  { %v470_v47 = vmax.f32 %v460_v42, 0.0  ;;  %v494_v48 = vsel %vm35_vm0, %v979_v41, 0.0  ;;  %v508_v49 = vmul.f32 %v979_v41, %v979_v41 }
 0x2a1   :  { %512 = vadd.xlane.f32.xlu0 %v511_v33  ;;  %v469_v44 = vmax.f32 %v455_v39, 0.0  ;;  %v491_v45 = vsel %vm35_vm0, %v976_v38, 0.0  ;;  %v507_v46 = vmul.f32 %v976_v38, %v976_v38 }
 0x2a2   :  { %v994_v52 = vadd.f32 %v470_v47, %v941_v1  ;;  %v526_v53 = vsel %vm35_vm0, %v508_v49, 0.0 }
 0x2a3   :  { %486 = vadd.xlane.f32.xlu1 %v485_v36  ;;  %v990_v50 = vadd.f32 %v469_v44, %v319_v2  ;;  %v523_v51 = vsel %vm35_vm0, %v507_v46, 0.0  ;;  %v1028_v36 = vld [vmem:[%s1098_s5] ss:$0 sm:$0xff] }
 0x2a4   :  { %v500_v56 = vsel %vm35_vm0, %v994_v52, 0.0  ;;  %v510_v57 = vmul.f32 %v994_v52, %v994_v52 }
 0x2a5   :  { %518 = vadd.xlane.f32.xlu0 %v517_v40  ;;  %v497_v54 = vsel %vm35_vm0, %v990_v50, 0.0  ;;  %v509_v55 = vmul.f32 %v990_v50, %v990_v50 }
 0x2a6   :  { %v532_v59 = vsel %vm35_vm0, %v510_v57, 0.0 }
 0x2a7   :  { %521 = vadd.xlane.f32.xlu1 %v520_v43  ;;  %v529_v58 = vsel %vm35_vm0, %v509_v55, 0.0 }
 0x2a9   :  { %492 = vadd.xlane.f32.xlu0 %v491_v45 }
 0x2ab   :  { %495 = vadd.xlane.f32.xlu1 %v494_v48 }
 0x2ad   :  { %524 = vadd.xlane.f32.xlu0 %v523_v51 }
 0x2af   :  { %527 = vadd.xlane.f32.xlu1 %v526_v53 }
 0x2b1   :  { %498 = vadd.xlane.f32.xlu0 %v497_v54 }
 0x2b3   :  { %501 = vadd.xlane.f32.xlu1 %v500_v56 }
 0x2b5   :  { %530 = vadd.xlane.f32.xlu0 %v529_v58 }
 0x2b7   :  { %533 = vadd.xlane.f32.xlu1 %v532_v59 }
 0x326   :  { %v484_v60 = vpop.xlane.xlu0 %483 }
 0x327   :  { %v536_v61 = vmul.f32 0.03125, %v484_v60 }
 0x328   :  { %v516_v62 = vpop.xlane.xlu1 %515 }
 0x329   :  { %v552_v63 = vmul.f32 %v536_v61, %v536_v61  ;;  %v544_v0 = vmul.f32 0.03125, %v516_v62 }
 0x32a   :  { %v481_v1 = vpop.xlane.xlu0 %480 }
 0x32b   :  { %v560_v2 = vsub.f32 %v544_v0, %v552_v63  ;;  %v535_v3 = vmul.f32 0.03125, %v481_v1 }
 0x32c   :  { %v490_v4 = vpop.xlane.xlu1 %489 }
 0x32d   :  { %v570_v5 = vadd.f32 1e-05, %v560_v2  ;;  %v551_v7 = vmul.f32 %v535_v3, %v535_v3  ;;  %v1007_v10 = vmul.f32 0.03125, %v490_v4 }
 0x32e   :  { %v513_v6 = vpop.xlane.xlu0 %512 }
 0x32f   :  { %806 = vrsqrt.f32 %v570_v5  ;;  %v543_v8 = vmul.f32 0.03125, %v513_v6  ;;  %v554_v20 = vmul.f32 %v1007_v10, %v1007_v10 }
 0x330   :  { %v487_v9 = vpop.xlane.xlu1 %486 }
 0x331   :  { %v559_v12 = vsub.f32 %v543_v8, %v551_v7  ;;  %v1009_v13 = vmul.f32 0.03125, %v487_v9 }
 0x332   :  { %v519_v14 = vpop.xlane.xlu0 %518 }
 0x333   :  { %v569_v16 = vadd.f32 1e-05, %v559_v12  ;;  %v553_v17 = vmul.f32 %v1009_v13, %v1009_v13  ;;  %v545_v18 = vmul.f32 0.03125, %v519_v14 }
 0x334   :  { %v522_v19 = vpop.xlane.xlu1 %521 }
 0x335   :  { %808 = vrsqrt.f32 %v569_v16  ;;  %v561_v22 = vsub.f32 %v545_v18, %v553_v17  ;;  %v546_v23 = vmul.f32 0.03125, %v522_v19 }
 0x336   :  { %v493_v25 = vpop.xlane.xlu0 %492 }
 0x337   :  { %v571_v27 = vadd.f32 1e-05, %v561_v22  ;;  %v562_v28 = vsub.f32 %v546_v23, %v554_v20  ;;  %v1020_v29 = vmul.f32 0.03125, %v493_v25 }
 0x338   :  { %v496_v30 = vpop.xlane.xlu1 %495 }
 0x339   :  { %v807_v31 = vpop.eup %806  ;;  %810 = vrsqrt.f32 %v571_v27  ;;  %v572_v32 = vadd.f32 1e-05, %v562_v28  ;;  %v1022_v33 = vmul.f32 0.03125, %v496_v30  ;;  %v555_v37 = vmul.f32 %v1020_v29, %v1020_v29 }
 0x33a   :  { %v592_v34 = vmul.f32 %v807_v31, %v1018_v26  ;;  %v525_v35 = vpop.xlane.xlu0 %524 }
 0x33b   :  { %812 = vrsqrt.f32 %v572_v32  ;;  %v547_v39 = vmul.f32 0.03125, %v525_v35  ;;  %v556_v43 = vmul.f32 %v1022_v33, %v1022_v33 }
 0x33c   :  { %v600_v40 = vmul.f32 %v592_v34, %v536_v61  ;;  %v528_v42 = vpop.xlane.xlu1 %527  ;;  %v622_v47 = vmul.f32 %v592_v34, %v950_v11 }
 0x33d   :  { %v563_v44 = vsub.f32 %v547_v39, %v555_v37  ;;  %v548_v45 = vmul.f32 0.03125, %v528_v42 }
 0x33e   :  { %v614_v46 = vsub.f32 %v1028_v36, %v600_v40  ;;  %v499_v48 = vpop.xlane.xlu0 %498 }
 0x33f   :  { %v809_v49 = vpop.eup %808  ;;  %v573_v51 = vadd.f32 1e-05, %v563_v44  ;;  %v564_v53 = vsub.f32 %v548_v45, %v556_v43  ;;  %v541_v54 = vmul.f32 0.03125, %v499_v48 }
 0x340   :  { %v630_v55 = vadd.f32 %v622_v47, %v614_v46  ;;  %v591_v56 = vmul.f32 %v809_v49, %v1018_v26  ;;  %v502_v57 = vpop.xlane.xlu1 %501 }
 0x341   :  { %814 = vrsqrt.f32 %v573_v51  ;;  %v574_v58 = vadd.f32 1e-05, %v564_v53  ;;  %v542_v59 = vmul.f32 0.03125, %v502_v57  ;;  %v557_v62 = vmul.f32 %v541_v54, %v541_v54 }
 0x342   :  { %638 = vst.msk [vmem:[%s1099_s6 + $0x8] sm:$0xff] %vm35_vm0, %v630_v55  ;;  %v599_v60 = vmul.f32 %v591_v56, %v535_v3  ;;  %v531_v61 = vpop.xlane.xlu0 %530  ;;  %v621_v1 = vmul.f32 %v591_v56, %v952_v15 }
 0x343   :  { %v811_v11 = vpop.eup %810  ;;  %816 = vrsqrt.f32 %v574_v58  ;;  %v549_v63 = vmul.f32 0.03125, %v531_v61  ;;  %v558_v6 = vmul.f32 %v542_v59, %v542_v59 }
 0x344   :  { %v613_v0 = vsub.f32 %v1028_v36, %v599_v60  ;;  %v593_v2 = vmul.f32 %v811_v11, %v1018_v26  ;;  %v534_v4 = vpop.xlane.xlu1 %533 }
 0x345   :  { %v813_v5 = vpop.eup %812  ;;  %v565_v7 = vsub.f32 %v549_v63, %v557_v62  ;;  %v550_v8 = vmul.f32 0.03125, %v534_v4 }
 0x346   :  { %v629_v9 = vadd.f32 %v621_v1, %v613_v0  ;;  %v601_v12 = vmul.f32 %v593_v2, %v1009_v13  ;;  %v594_v3 = vmul.f32 %v813_v5, %v1018_v26  ;;  %v623_v17 = vmul.f32 %v593_v2, %v961_v24 }
 0x347   :  { %v575_v14 = vadd.f32 1e-05, %v565_v7  ;;  %v566_v16 = vsub.f32 %v550_v8, %v558_v6 }
 0x348   :  { %637 = vst.msk [vmem:[%s1099_s6] sm:$0xff] %vm35_vm0, %v629_v9  ;;  %v615_v15 = vsub.f32 %v1028_v36, %v601_v12  ;;  %v602_v18 = vmul.f32 %v594_v3, %v1007_v10  ;;  %v624_v22 = vmul.f32 %v594_v3, %v958_v21 }
 0x349   :  { %818 = vrsqrt.f32 %v575_v14  ;;  %v576_v19 = vadd.f32 1e-05, %v566_v16 }
 0x34a   :  { %v631_v20 = vadd.f32 %v623_v17, %v615_v15  ;;  %v616_v13 = vsub.f32 %v1028_v36, %v602_v18 }
 0x34b   :  { %v815_v23 = vpop.eup %814  ;;  %820 = vrsqrt.f32 %v576_v19 }
 0x34c   :  { %639 = vst.msk [vmem:[%s1099_s6 + $0x10] sm:$0xff] %vm35_vm0, %v631_v20  ;;  %v632_v25 = vadd.f32 %v624_v22, %v616_v13  ;;  %v595_v27 = vmul.f32 %v815_v23, %v1018_v26 }
 0x34d   :  { %v817_v24 = vpop.eup %816 }
 0x34e   :  { %640 = vst.msk [vmem:[%s1099_s6 + $0x18] sm:$0xff] %vm35_vm0, %v632_v25  ;;  %v603_v10 = vmul.f32 %v595_v27, %v1020_v29  ;;  %v596_v21 = vmul.f32 %v817_v24, %v1018_v26  ;;  %v625_v30 = vmul.f32 %v595_v27, %v976_v38 }
 0x350   :  { %v617_v28 = vsub.f32 %v1028_v36, %v603_v10  ;;  %v604_v31 = vmul.f32 %v596_v21, %v1022_v33  ;;  %v626_v35 = vmul.f32 %v596_v21, %v979_v41 }
 0x352   :  { %v633_v32 = vadd.f32 %v625_v30, %v617_v28  ;;  %v618_v34 = vsub.f32 %v1028_v36, %v604_v31 }
 0x353   :  { %v819_v37 = vpop.eup %818 }
 0x354   :  { %641 = vst.msk [vmem:[%s1099_s6 + $0x20] sm:$0xff] %vm35_vm0, %v633_v32  ;;  %v634_v29 = vadd.f32 %v626_v35, %v618_v34  ;;  %v597_v39 = vmul.f32 %v819_v37, %v1018_v26 }
 0x355   :  { %v821_v40 = vpop.eup %820 }
 0x356   :  { %642 = vst.msk [vmem:[%s1099_s6 + $0x28] sm:$0xff] %vm35_vm0, %v634_v29  ;;  %v605_v38 = vmul.f32 %v597_v39, %v541_v54  ;;  %v598_v33 = vmul.f32 %v821_v40, %v1018_v26  ;;  %v627_v42 = vmul.f32 %v597_v39, %v990_v50 }
 0x358   :  { %v619_v41 = vsub.f32 %v1028_v36, %v605_v38  ;;  %v606_v43 = vmul.f32 %v598_v33, %v542_v59  ;;  %v628_v46 = vmul.f32 %v598_v33, %v994_v52 }
 0x35a   :  { %v635_v44 = vadd.f32 %v627_v42, %v619_v41  ;;  %v620_v45 = vsub.f32 %v1028_v36, %v606_v43 }
 0x35c   :  { %643 = vst.msk [vmem:[%s1099_s6 + $0x30] sm:$0xff] %vm35_vm0, %v635_v44  ;;  %v636_v47 = vadd.f32 %v628_v46, %v620_v45 }
 0x35e   :  { %644 = vst.msk [vmem:[%s1099_s6 + $0x38] sm:$0xff] %vm35_vm0, %v636_v47 }

</bundles_post_ra>
